<compile_context>
chip_gen: v6e
topology: v6e:2x2x1
jax: 0.10.0
libtpu: 0.0.40
codegen_flags: <defaults>
</compile_context>

<pallas_src>
import functools
import math

import numpy as np
import jax
import jax.numpy as jnp
from jax.experimental import pallas as pl
from jax.experimental.pallas import tpu as pltpu


# ----------------------------- sinusoid table ------------------------------

def sinusoid_table(max_len, channels):
    pos = np.arange(max_len, dtype=np.float32)[:, None]
    div = np.exp(np.arange(0, channels, 2, dtype=np.float32)
                 * (-math.log(10000.0) / channels))
    pe = np.zeros((max_len, channels), np.float32)
    pe[:, 0::2] = np.sin(pos * div)
    pe[:, 1::2] = np.cos(pos * div)
    return jnp.asarray(pe)


# ------------------------------- the kernel --------------------------------

def _repeat_pe_kernel(dur_ref, x_ref, pe_ref, o_ref, *, train, batch, words, max_len):
    """One grid step = one batch element; whole (F, C) slab resident in VMEM.

    dur_ref : SMEM (B, T) int32 word durations (scalar prefetch)
    x_ref   : VMEM (1, F, C) activations for this batch
    pe_ref  : VMEM (max_len, C) sinusoid table
    o_ref   : VMEM (1, F, C) output
    """
    b = pl.program_id(0)
    F = x_ref.shape[1]
    x = x_ref[0]                                               # (F, C)

    fidx = jax.lax.broadcasted_iota(jnp.int32, (F, 1), 0)      # frame index per row

    cum = jnp.int32(0)                       # running (inclusive) end of word span
    word = jnp.zeros((F, 1), jnp.int32)      # word index each frame falls into
    startsum = jnp.zeros((F, 1), jnp.int32)  # start offset of that word

    if train:
        # Per-batch durations: every frame inside word j's span gets pe[j].
        for j in range(words):
            d = dur_ref[b, j]
            cum = cum + d
            past = (fidx >= cum).astype(jnp.int32)
            word = word + past
            startsum = startsum + d * past
        row = word                                   # pe row = word index
        do_add = fidx < cum                          # frames past total: untouched
    else:
        # Eval: durations flattened over (B*T); only batch column 0 is modified,
        # and each frame gets pe[frame_offset_within_word].
        for i in range(batch * words):
            d = dur_ref[i // words, i % words]
            cum = cum + d
            past = (fidx >= cum).astype(jnp.int32)
            word = word + past
            startsum = startsum + d * past
        row = fidx - startsum                        # offset within the word
        do_add = jnp.logical_and(fidx < cum, b == 0)

    # One-hot row selection -> MXU "gather" of pe rows (exact for one-hot weights).
    rows = jax.lax.broadcasted_iota(jnp.int32, (F, max_len), 1)
    onehot = jnp.logical_and(rows == row, do_add).astype(jnp.float32)   # (F, max_len)
    pe_add = jnp.dot(onehot, pe_ref[...], preferred_element_type=jnp.float32)

    o_ref[0] = (x + pe_add).astype(o_ref.dtype)


# -------------------------------- wrapper ----------------------------------

def repeat_word_positional_encoding(x, text_duration, pe, train):
    """x: (F, B, C) float32, text_duration: (B, T) int, pe: (max_len, C)."""
    F, B, C = x.shape
    max_len = pe.shape[0]
    T = text_duration.shape[-1]

    dur = text_duration.astype(jnp.int32).reshape(B, T)
    xb = jnp.transpose(x, (1, 0, 2))                 # (B, F, C): lane dim = C (dense)

    kern = functools.partial(_repeat_pe_kernel, train=train,
                             batch=B, words=T, max_len=max_len)

    out = pl.pallas_call(
        kern,
        grid_spec=pltpu.PrefetchScalarGridSpec(
            num_scalar_prefetch=1,
            grid=(B,),
            in_specs=[pl.BlockSpec((1, F, C), lambda b, dur: (b, 0, 0)),
                      pl.BlockSpec((max_len, C), lambda b, dur: (0, 0))],
            out_specs=pl.BlockSpec((1, F, C), lambda b, dur: (b, 0, 0)),
        ),
        out_shape=jax.ShapeDtypeStruct((B, F, C), x.dtype),
        compiler_params=pltpu.CompilerParams(
            dimension_semantics=("parallel",)),       # v7x: both TensorCores
    )(dur, xb, pe)

    # TODO(synk): nn.Dropout(p=0.1) omitted (identity, deterministic output).
    return jnp.transpose(out, (1, 0, 2))              # back to (F, B, C)


# -------------------------- pure-numpy reference ----------------------------

def _ref_forward(xv, dur, pe_np, train):
    xr = np.array(xv).copy()
    d = np.array(dur).astype(np.int64)
    p = np.array(pe_np)
    if train:
        for i, interval in enumerate(d):
            new_pos = 0
            for j, wd in enumerate(interval):
                xr[new_pos:new_pos + wd, i, :] += p[j:j + 1, :]
                new_pos += wd
    else:
        new_pos = 0
        for wd in d.reshape(-1):
            xr[new_pos:new_pos + wd, 0, :] += p[0:wd, :]
            new_pos += wd
    return xr


# ----------------------------------- main -----------------------------------

if __name__ == "__main__":
    key = jax.random.PRNGKey(0)

    F, B, C, T, MAX_LEN = 32, 2, 128, 8, 128
    x = jax.random.normal(key, (F, B, C), jnp.float32)
    text_duration = jnp.array([[2, 2, 2, 2, 2, 2, 2, 2],
                               [3, 3, 3, 3, 1, 1, 0, 0]], dtype=jnp.int32)
    pe = sinusoid_table(MAX_LEN, C)

    out_train = jax.block_until_ready(
        repeat_word_positional_encoding(x, text_duration, pe, train=True))
    out_eval = jax.block_until_ready(
        repeat_word_positional_encoding(x, text_duration, pe, train=False))

    assert out_train.shape == (F, B, C), out_train.shape
    assert out_eval.shape == (F, B, C), out_eval.shape
    np.testing.assert_allclose(np.array(out_train),
                               _ref_forward(x, text_duration, pe, True),
                               rtol=1e-6, atol=1e-6)
    np.testing.assert_allclose(np.array(out_eval),
                               _ref_forward(x, text_duration, pe, False),
                               rtol=1e-6, atol=1e-6)
    assert np.all(np.isfinite(np.array(out_train)))
    assert np.all(np.isfinite(np.array(out_eval)))
    print("KERNEL_OK")
</pallas_src>

<mosaic_0001>
module attributes {stable_mosaic.version = 11 : i64} {
  func.func @_repeat_pe_kernel(%arg0: i32, %arg1: memref<2x8xi32, #tpu.memory_space<smem>>, %arg2: memref<1x32x128xf32, #tpu.memory_space<vmem>>, %arg3: memref<128x128xf32, #tpu.memory_space<vmem>>, %arg4: memref<1x32x128xf32, #tpu.memory_space<vmem>>) attributes {dimension_semantics = [#tpu.dimension_semantics<parallel>], iteration_bounds = array<i64: 2>, scalar_prefetch = 1 : i64, scratch_operands = 0 : i64, tpu.core_type = #tpu.core_type<tc>, window_params = [{transform_indices = @transform_0, window_bounds = array<i64: 1, 32, 128>}, {pipeline_mode = #tpu.pipeline_mode<synchronous>, transform_indices = @transform_1, window_bounds = array<i64: 128, 128>}, {transform_indices = @transform_2, window_bounds = array<i64: 1, 32, 128>}]} {
    %c0 = arith.constant 0 : index
    %c0_0 = arith.constant 0 : index
    %c0_1 = arith.constant 0 : index
    %0 = vector.load %arg2[%c0, %c0_0, %c0_1] : memref<1x32x128xf32, #tpu.memory_space<vmem>>, vector<1x32x128xf32>
    %1 = vector.shape_cast %0 : vector<1x32x128xf32> to vector<32x128xf32>
    %2 = tpu.iota {dimensions = array<i32: 0>} : vector<32x1xi32>
    %c0_i32 = arith.constant 0 : i32
    %3 = vector.broadcast %c0_i32 : i32 to vector<32x1xi32>
    %4 = arith.index_cast %arg0 : i32 to index
    %c0_2 = arith.constant 0 : index
    %5 = memref.load %arg1[%4, %c0_2] : memref<2x8xi32, #tpu.memory_space<smem>>
    %c0_i32_3 = arith.constant 0 : i32
    %6 = arith.addi %c0_i32_3, %5 : i32
    %7 = vector.broadcast %6 : i32 to vector<32x1xi32>
    %8 = arith.cmpi sge, %2, %7 : vector<32x1xi32>
    %9 = arith.extui %8 : vector<32x1xi1> to vector<32x1xi32>
    %10 = arith.addi %3, %9 : vector<32x1xi32>
    %11 = arith.index_cast %arg0 : i32 to index
    %c1 = arith.constant 1 : index
    %12 = memref.load %arg1[%11, %c1] : memref<2x8xi32, #tpu.memory_space<smem>>
    %13 = arith.addi %6, %12 : i32
    %14 = vector.broadcast %13 : i32 to vector<32x1xi32>
    %15 = arith.cmpi sge, %2, %14 : vector<32x1xi32>
    %16 = arith.extui %15 : vector<32x1xi1> to vector<32x1xi32>
    %17 = arith.addi %10, %16 : vector<32x1xi32>
    %18 = arith.index_cast %arg0 : i32 to index
    %c2 = arith.constant 2 : index
    %19 = memref.load %arg1[%18, %c2] : memref<2x8xi32, #tpu.memory_space<smem>>
    %20 = arith.addi %13, %19 : i32
    %21 = vector.broadcast %20 : i32 to vector<32x1xi32>
    %22 = arith.cmpi sge, %2, %21 : vector<32x1xi32>
    %23 = arith.extui %22 : vector<32x1xi1> to vector<32x1xi32>
    %24 = arith.addi %17, %23 : vector<32x1xi32>
    %25 = arith.index_cast %arg0 : i32 to index
    %c3 = arith.constant 3 : index
    %26 = memref.load %arg1[%25, %c3] : memref<2x8xi32, #tpu.memory_space<smem>>
    %27 = arith.addi %20, %26 : i32
    %28 = vector.broadcast %27 : i32 to vector<32x1xi32>
    %29 = arith.cmpi sge, %2, %28 : vector<32x1xi32>
    %30 = arith.extui %29 : vector<32x1xi1> to vector<32x1xi32>
    %31 = arith.addi %24, %30 : vector<32x1xi32>
    %32 = arith.index_cast %arg0 : i32 to index
    %c4 = arith.constant 4 : index
    %33 = memref.load %arg1[%32, %c4] : memref<2x8xi32, #tpu.memory_space<smem>>
    %34 = arith.addi %27, %33 : i32
    %35 = vector.broadcast %34 : i32 to vector<32x1xi32>
    %36 = arith.cmpi sge, %2, %35 : vector<32x1xi32>
    %37 = arith.extui %36 : vector<32x1xi1> to vector<32x1xi32>
    %38 = arith.addi %31, %37 : vector<32x1xi32>
    %39 = arith.index_cast %arg0 : i32 to index
    %c5 = arith.constant 5 : index
    %40 = memref.load %arg1[%39, %c5] : memref<2x8xi32, #tpu.memory_space<smem>>
    %41 = arith.addi %34, %40 : i32
    %42 = vector.broadcast %41 : i32 to vector<32x1xi32>
    %43 = arith.cmpi sge, %2, %42 : vector<32x1xi32>
    %44 = arith.extui %43 : vector<32x1xi1> to vector<32x1xi32>
    %45 = arith.addi %38, %44 : vector<32x1xi32>
    %46 = arith.index_cast %arg0 : i32 to index
    %c6 = arith.constant 6 : index
    %47 = memref.load %arg1[%46, %c6] : memref<2x8xi32, #tpu.memory_space<smem>>
    %48 = arith.addi %41, %47 : i32
    %49 = vector.broadcast %48 : i32 to vector<32x1xi32>
    %50 = arith.cmpi sge, %2, %49 : vector<32x1xi32>
    %51 = arith.extui %50 : vector<32x1xi1> to vector<32x1xi32>
    %52 = arith.addi %45, %51 : vector<32x1xi32>
    %53 = arith.index_cast %arg0 : i32 to index
    %c7 = arith.constant 7 : index
    %54 = memref.load %arg1[%53, %c7] : memref<2x8xi32, #tpu.memory_space<smem>>
    %55 = arith.addi %48, %54 : i32
    %56 = vector.broadcast %55 : i32 to vector<32x1xi32>
    %57 = arith.cmpi sge, %2, %56 : vector<32x1xi32>
    %58 = arith.extui %57 : vector<32x1xi1> to vector<32x1xi32>
    %59 = arith.addi %52, %58 : vector<32x1xi32>
    %60 = vector.broadcast %55 : i32 to vector<32x1xi32>
    %61 = arith.cmpi slt, %2, %60 : vector<32x1xi32>
    %62 = tpu.iota {dimensions = array<i32: 1>} : vector<32x128xi32>
    %63 = vector.broadcast %59 : vector<32x1xi32> to vector<32x128xi32>
    %64 = arith.cmpi eq, %62, %63 : vector<32x128xi32>
    %65 = vector.broadcast %61 : vector<32x1xi1> to vector<32x128xi1>
    %66 = arith.andi %64, %65 : vector<32x128xi1>
    %67 = arith.extui %66 : vector<32x128xi1> to vector<32x128xi32>
    %68 = arith.sitofp %67 : vector<32x128xi32> to vector<32x128xf32>
    %c0_4 = arith.constant 0 : index
    %c0_5 = arith.constant 0 : index
    %69 = vector.load %arg3[%c0_4, %c0_5] : memref<128x128xf32, #tpu.memory_space<vmem>>, vector<128x128xf32>
    %cst = arith.constant dense<0.000000e+00> : vector<32x128xf32>
    %70 = tpu.matmul %68, %69, %cst {dimension_numbers = #tpu.dot_dimension_numbers<[1], [0], [0], [1], [0, 0, 1, 1], [], []>} : vector<32x128xf32>, vector<128x128xf32>, vector<32x128xf32> -> vector<32x128xf32>
    %71 = arith.addf %1, %70 : vector<32x128xf32>
    %c0_6 = arith.constant 0 : index
    %c0_7 = arith.constant 0 : index
    %c0_8 = arith.constant 0 : index
    %72 = vector.load %arg4[%c0_6, %c0_7, %c0_8] : memref<1x32x128xf32, #tpu.memory_space<vmem>>, vector<1x32x128xf32>
    %73 = vector.shape_cast %72 : vector<1x32x128xf32> to vector<32x128xf32>
    %74 = vector.shape_cast %71 : vector<32x128xf32> to vector<1x32x128xf32>
    tpu.vector_store %arg4[%c0_6, %c0_7, %c0_8], %74 {strides = array<i32>} : memref<1x32x128xf32, #tpu.memory_space<vmem>>, vector<1x32x128xf32>,
    return
  }
  func.func @transform_0(%arg0: i32, %arg1: memref<2x8xi32, #tpu.memory_space<smem>>) -> (i32, i32, i32) {
    %c0_i32 = arith.constant 0 : i32
    %c0_i32_0 = arith.constant 0 : i32
    %c0_i32_1 = arith.constant 0 : i32
    return %arg0, %c0_i32, %c0_i32_0 : i32, i32, i32
  }
  func.func @transform_1(%arg0: i32, %arg1: memref<2x8xi32, #tpu.memory_space<smem>>) -> (i32, i32) {
    %c0_i32 = arith.constant 0 : i32
    %c0_i32_0 = arith.constant 0 : i32
    %c0_i32_1 = arith.constant 0 : i32
    return %c0_i32, %c0_i32_0 : i32, i32
  }
  func.func @transform_2(%arg0: i32, %arg1: memref<2x8xi32, #tpu.memory_space<smem>>) -> (i32, i32, i32) {
    %c0_i32 = arith.constant 0 : i32
    %c0_i32_0 = arith.constant 0 : i32
    %c0_i32_1 = arith.constant 0 : i32
    return %arg0, %c0_i32, %c0_i32_0 : i32, i32, i32
  }
}

</mosaic_0001>

<bundles_post_ra>
// kernel: tpu_custom_call.1
= control target key start
LH: loop header
LB: loop body
LE: loop exit
PB: predicated region body
PF: predicated region fallthrough
CT: control target
= control target key end

     0   :  { %s865_s12 = smov [#allocation3]   ;;  %s1289_s0 = inlined_call_operand.hbm [shape: s32[2,8], index: 0, kind: input, shape index: {}]   ;;  %s1290_s1 = inlined_call_operand.hbm [shape: f32[2,32,128], index: 1, kind: input, shape index: {}]   ;;  %s1291_s2 = inlined_call_operand.hbm [shape: f32[128,128], index: 2, kind: input, shape index: {}]   ;;  %s1292_s3 = inlined_call_operand.hbm [shape: f32[2,32,128], index: 3, kind: output, shape index: {}]  }
   0x1   :  { %9 = dma.hbm_to_smem %s1289_s0, 32, %s865_s12, [#allocation2] }
   0x2   :  { %835 = dma.done.wait [#allocation2], 32 }
   0x3   :  { %836 = vsyncadd [#allocation2], 4294967264 }
   0x4   :  { %11 = sfence }
   0x5   :  { %12 = vsyncpa [#allocation5], 0 }
   0x6   :  { %14 = vsyncpa [#allocation5 + $0x1], 0 }
   0x7   :  { %15 = vsyncpa [#allocation8], 0 }
   0x8   :  { %16 = vsyncpa [#allocation6], 0 }
   0x9   :  { %18 = vsyncpa [#allocation6 + $0x1], 0  ;;  %s898_s15 = smov 0   ;;  %s900_s16 = smov 0  }
   0xa   :  { %s902_s17 = smov 0   ;;  %s904_s18 = smov 0  }
   0xb LB: > { %s919_s0 = sadd.s32 4294967295, %s863_s18   ;;  %s550_s19 = sadd.s32 4294967294, %s863_s18   ;;  %s863_s18 = sphi %s904_s18, %s1314_s18   ;;  %s859_s17 = sphi %s902_s17, %s1313_s17   ;;  %s855_s16 = sphi %s900_s16, %s1312_s16   ;;  %s851_s15 = sphi %s898_s15, %s1311_s15  }
   0xc   : > { %p44_p0 = scmp.ne.s32.totalorder %s855_s16, %s851_s15  ;;  %p1293_p1 = scmp.eq.s32.totalorder %s919_s0, 0 }
   0xd   : > { %p95_p3 = scmp.eq.s32.totalorder %s550_s19, 1  ;;  %p551_p5 = scmp.ge.s32.totalorder %s863_s18, 1 }
   0xe   : > { %p928_p4 = por %p1293_p1, %p44_p0  ;;  %p102_p7 = scmp.lt.s32.totalorder %s863_s18, 3 }
   0xf   : > { %p933_p6 = por %p95_p3, %p44_p0  ;;  %s866_s23 = smov [#allocation7]  }
  0x10   : > { %s1297_s20 = scalar_select %p928_p4, 1, 0 }
  0x11   : > { %s1298_s21 = scalar_select %p933_p6, 1, 0 }
  0x12   : > { %p938_p8 = pnand %p551_p5, %p102_p7  ;;  %s114_s24 = sshll.u32 %s866_s23, 4  ;;  %s115_s24 = int_to_ptr.vmem [resolvable:$true] %s114_s24 }
  0x13   : > { %s952_s26 = sadd.s32 1, %s863_s18   ;;  %s31_s27 = sadd.s32 1, %s859_s17 }
  0x14   : > { %s1299_s22 = scalar_select %p938_p8, 1, 0 }
  0x15   : > { %p675_p9 = pneg %p938_p8  ;;  %s28_s28 = ssub.s32 %s863_s18, %s952_s26 }
  0x16   : > { %s750_s29 = scalar_lea.vmem %s115_s24, 2048  ;;  %p758_p5 = scmp.lt.s32.totalorder %s115_s24, %s115_s24 }
  0x17   : > { %p947_p11 = pnand %p675_p9, %p1293_p1  ;;  %p751_p13 = scmp.ne.s32.totalorder %s115_s24, %s750_s29 }
  0x18   : > { %p759_p7 = scmp.lt.s32.totalorder %s750_s29, %s750_s29 }
  0x19   : > { %p741_p12 = pneg %p947_p11 }
  0x1a   : > { %p760_p10 = por %p759_p7, %p758_p5 }
  0x1b   : > { %p753_p0 = pnand %p751_p13, %p741_p12 }
  0x1d   : > { %p754_p3 = pneg %p753_p0 }
  0x1f   : > { %p761_p2 = pnand %p760_p10, %p754_p3 }
  0x21   : > { %764 = shalt.err (!%p761_p2)
}
  0x22   : > { %s867_s30 = smov 128   ;;  %s868_s4 = smov 8  }
  0x23   : > { %678 = dma.hbm_to_vmem [thread:$0]  (!%p947_p11), %s1291_s2, 2048, %s115_s24, [#allocation8], %s867_s30, %s867_s30, %s868_s4  }
  0x24   : > { %p29_p2 = scmp.eq.s32.totalorder %s28_s28, 0  ;;  %p38_p9 = scmp.ne.s32.totalorder %s859_s17, %s855_s16 }
  0x25   : > { %p39_p10 = scmp.eq.s32.totalorder %s863_s18, 0  ;;  %p688_p12 = scmp.lt.s32.totalorder %s863_s18, 2 }
  0x26   : > { %s972_s7 = scalar_select %p29_p2, %s859_s17, %s31_s27  }
  0x27   : > { %p40_p13 = por %p39_p10, %p38_p9  ;;  %p1301_p0 = scmp.eq.s32.totalorder %s919_s0, 1 }
  0x28   : > { %s128_s9 = sand.u32 1, %s859_s17   ;;  %s575_s10 = sshll.u32 %s863_s18, 9 }
  0x29   : > { %p976_p3 = por %p1301_p0, %p38_p9  ;;  %s554_s11 = sshll.u32 %s128_s9, 5 }
  0x2a   : > { %s985_s14 = scalar_lea.hbm %s1290_s1, %s575_s10  ;;  %s132_s19 = scalar_lea.vmem [#allocation4], %s554_s11 }
  0x2b   : > { %s1302_s8 = scalar_select %p976_p3, 1, 0 }
  0x2c   : > { %s139_s23 = sshll.u32 %s132_s19, 4  ;;  %p987_p11 = pnand %p688_p12, %p40_p13  ;;  %s991_s23 = int_to_ptr.vmem [resolvable:$true] %s139_s23 }
  0x2d   : > { %s993_s25 = scalar_lea.sflag [#allocation5], %s128_s9  ;;  %s765_s27 = scalar_lea.hbm %s985_s14, 512 }
  0x2e   : > { %p766_p5 = scmp.ne.s32.totalorder %s985_s14, %s765_s27  ;;  %p767_p7 = pneg %p987_p11 }
  0x2f   : > { %s770_s5 = scalar_lea.hbm %s1290_s1, 1024  ;;  %p771_p10 = scmp.lt.s32.totalorder %s985_s14, %s1290_s1 }
  0x30   : > { %p768_p2 = pnand %p767_p7, %p766_p5  ;;  %p772_p12 = scmp.lt.s32.totalorder %s770_s5, %s765_s27 }
  0x32   : > { %p769_p9 = pneg %p768_p2  ;;  %p773_p13 = por %p772_p12, %p771_p10 }
  0x34   : > { %p774_p0 = pnand %p773_p13, %p769_p9 }
  0x36   : > { %777 = shalt.err (!%p774_p0)
}
  0x37   : > { %s778_s9 = scalar_lea.vmem %s991_s23, 512  ;;  %s869_s11 = smov [#allocation4]  }
  0x38   : > { %p779_p1 = scmp.ne.s32.totalorder %s991_s23, %s778_s9  ;;  %s783_s12 = sshll.u32 %s869_s11, 4  ;;  %s784_s12 = int_to_ptr.vmem [resolvable:$false] %s783_s12 }
  0x39   : > { %s785_s13 = scalar_lea.vmem %s784_s12, 1024  ;;  %p786_p2 = scmp.lt.s32.totalorder %s991_s23, %s784_s12 }
  0x3a   : > { %p781_p6 = pnand %p779_p1, %p767_p7  ;;  %p787_p3 = scmp.lt.s32.totalorder %s785_s13, %s778_s9 }
  0x3c   : > { %p782_p5 = pneg %p781_p6  ;;  %p788_p4 = por %p787_p3, %p786_p2 }
  0x3e   : > { %p789_p8 = pnand %p788_p4, %p782_p5 }
  0x40   : > { %792 = shalt.err (!%p789_p8)
}
  0x41   : > { %682 = dma.hbm_to_vmem [thread:$0]  (!%p987_p11), %s985_s14, 512, %s991_s23, %s993_s25, %s867_s30, %s867_s30, %s868_s4  }
  0x42   : > { %p1304_p1 = scmp.ne.s32.totalorder %s1299_s22, 0 }
  0x43   : > { %s1020_s19 = sand.u32 (!%p1304_p1), 1, %s855_s16   ;;  %p1305_p4 = scmp.ne.s32.totalorder (!%p1304_p1), %s1297_s20, 0 }
  0x44   : > { %151 = sbr.rel (%p1304_p1) target bundleno = 332 (0x14c), region = 28  ;;  %s558_s27 = sshll.u32 (!%p1304_p1), %s1020_s19, 5 }
  0x45   : > { %s154_s28 = scalar_lea.sflag (!%p1304_p1), [#allocation5], %s1020_s19  ;;  %s1026_s24 = scalar_lea.vmem (!%p1304_p1), [#allocation4], %s558_s27 }
  0x49   : > { %838 = dma.done.wait (%p1305_p4), %s154_s28, 512  }
  0x4a   : > { %840 = vsyncadd (%p1305_p4), %s154_s28, 4294966784  ;;  %p1306_p6 = scmp.eq.s32.totalorder %s919_s0, 0 }
  0x4c   : > { %842 = dma.done.wait (%p1306_p6), [#allocation8], 2048   ;;  %p1307_p8 = pmov %p1306_p6 }
  0x4d   : > { %v186_v0 = vlaneseq  ;;  %s561_s22 = sshll.u32 %s919_s0, 7  ;;  %v359_v3 = vld [vmem:[#allocation7 + $0x78] sm:$0xff]  ;;  %v358_v4 = vld [vmem:[#allocation7 + $0x70] sm:$0xff]  ;;  %v357_v6 = vld [vmem:[#allocation7 + $0x68] sm:$0xff]  ;;  %v870_v7 = vmov 0   ;;  %p1308_p11 = scmp.ne.s32.totalorder %s1302_s8, 0 }
  0x4e   : > { %844 = vsyncadd (%p1307_p8), [#allocation8], 4294965248  ;;  %s192_s30 = sld [smem:[#allocation3 + %s561_s22]]  ;;  %s202_s4 = sadd.s32 1, %s561_s22  ;;  %597 = vmatprep.subr.mxu0 %v359_v3  ;;  %635 = vmatprep.subr.mxu1 %v359_v3  ;;  %v356_v13 = vld [vmem:[#allocation7 + $0x60] sm:$0xff]  ;;  %v355_v20 = vld [vmem:[#allocation7 + $0x58] sm:$0xff] }
  0x4f   : > { %v1038_v1 = vshrl.u32 %v186_v0, 7  ;;  %s203_s14 = sld [smem:[#allocation3 + %s202_s4]]  ;;  %s218_s23 = sadd.s32 2, %s561_s22  ;;  %598 = vmatpush3.msra.mxu0 %v359_v3  ;;  %651 = vmatpush3.msra.mxu1 %v359_v3  ;;  %v354_v26 = vld [vmem:[#allocation7 + $0x50] sm:$0xff]  ;;  %v353_v32 = vld [vmem:[#allocation7 + $0x48] sm:$0xff]  ;;  %v352_v38 = vld [vmem:[#allocation7 + $0x40] sm:$0xff] }
  0x50   : > { %s219_s25 = sld [smem:[#allocation3 + %s218_s23]]  ;;  %s234_s29 = sadd.s32 3, %s561_s22  ;;  %599 = vmatprep.subr.mxu0 %v358_v4  ;;  %636 = vmatprep.subr.mxu1 %v358_v4  ;;  %v351_v45 = vld [vmem:[#allocation7 + $0x38] sm:$0xff]  ;;  %v350_v52 = vld [vmem:[#allocation7 + $0x30] sm:$0xff]  ;;  %v349_v57 = vld [vmem:[#allocation7 + $0x28] sm:$0xff]  ;;  %v1159_v60 = vand.u32 127, %v186_v0 }
  0x51   : > { %s1040_s20 = sld [smem:[#allocation3 + %s234_s29]]  ;;  %s250_s5 = sadd.s32 4, %s561_s22  ;;  %v1043_v2 = vadd.s32 16, %v1038_v1  ;;  %v1063_v10 = vadd.s32 8, %v1038_v1  ;;  %600 = vmatpush3.msra.mxu0 %v358_v4  ;;  %652 = vmatpush3.msra.mxu1 %v358_v4  ;;  %v1139_v44 = vadd.s32 24, %v1038_v1  ;;  %v348_v63 = vld [vmem:[#allocation7 + $0x20] sm:$0xff] }
  0x52   : > { %s1045_s6 = sld [smem:[#allocation3 + %s250_s5]]  ;;  %s266_s10 = sadd.s32 5, %s561_s22  ;;  %601 = vmatprep.subr.mxu0 %v357_v6  ;;  %637 = vmatprep.subr.mxu1 %v357_v6 }
  0x53   : > { %s1047_s9 = sld [smem:[#allocation3 + %s266_s10]]  ;;  %s282_s11 = sadd.s32 6, %s561_s22  ;;  %602 = vmatpush3.msra.mxu0 %v357_v6  ;;  %653 = vmatpush3.msra.mxu1 %v357_v6 }
  0x54   : > { %v1049_v5 = vstv %s192_s30  ;;  %s1051_s12 = sld [smem:[#allocation3 + %s282_s11]]  ;;  %s298_s13 = sadd.s32 7, %s561_s22  ;;  %603 = vmatprep.subr.mxu0 %v356_v13  ;;  %638 = vmatprep.subr.mxu1 %v356_v13 }
  0x55   : > { %vm194_vm0 = vcmp.ge.s32.totalorder %v1038_v1, %v1049_v5  ;;  %s204_s28 = sadd.s32 %s203_s14, %s192_s30  ;;  %s1055_s4 = sld [smem:[#allocation3 + %s298_s13]]  ;;  %vm196_vm1 = vcmp.ge.s32.totalorder %v1043_v2, %v1049_v5  ;;  %vm195_vm7 = vcmp.ge.s32.totalorder %v1063_v10, %v1049_v5  ;;  %604 = vmatpush3.msra.mxu0 %v356_v13  ;;  %654 = vmatpush3.msra.mxu1 %v356_v13 }
  0x56   : > { %v198_v8 = vsel %vm194_vm0, 1, %v870_v7  ;;  %v1060_v9 = vstv %s204_s28  ;;  %s220_s22 = sadd.s32 %s219_s25, %s204_s28  ;;  %v200_v12 = vsel %vm196_vm1, 1, %v870_v7  ;;  %605 = vmatprep.subr.mxu0 %v355_v20  ;;  %639 = vmatprep.subr.mxu1 %v355_v20  ;;  %v199_v31 = vsel %vm195_vm7, 1, %v870_v7  ;;  %s454_s11 = scalar_lea.sflag [#allocation6], %s1020_s19 }
  0x57   : > { %vm206_vm2 = vcmp.ge.s32.totalorder %v1038_v1, %v1060_v9  ;;  %v1067_v11 = vstv %s220_s22  ;;  %s236_s30 = sadd.s32 %s1040_s20, %s220_s22  ;;  %vm208_vm3 = vcmp.ge.s32.totalorder %v1043_v2, %v1060_v9  ;;  %vm207_vm11 = vcmp.ge.s32.totalorder %v1063_v10, %v1060_v9  ;;  %606 = vmatpush3.msra.mxu0 %v355_v20  ;;  %655 = vmatpush3.msra.mxu1 %v355_v20  ;;  %v345_v20 = vld [vmem:[#allocation7 + $0x8] sm:$0xff]  ;;  %s181_s20 = scalar_lea.vmem [#allocation9], %s558_s27 }
  0x58   : > { %v210_v14 = vsel %vm206_vm2, 1, %v870_v7  ;;  %vm222_vm4 = vcmp.ge.s32.totalorder %v1038_v1, %v1067_v11  ;;  %v1076_v15 = vstv %s236_s30  ;;  %s252_s14 = sadd.s32 %s1045_s6, %s236_s30  ;;  %v212_v16 = vsel %vm208_vm3, 1, %v870_v7  ;;  %607 = vmatprep.subr.mxu0 %v354_v26  ;;  %640 = vmatprep.subr.mxu1 %v354_v26  ;;  %s467_s5 = sshll.u32 %s181_s20, 4  ;;  %s1241_s5 = int_to_ptr.vmem [resolvable:$true] %s467_s5 }
  0x59   : > { %v214_v17 = vadd.s32 %v210_v14, %v198_v8  ;;  %v226_v18 = vsel %vm222_vm4, 1, %v870_v7  ;;  %vm238_vm5 = vcmp.ge.s32.totalorder %v1038_v1, %v1076_v15  ;;  %v1083_v19 = vstv %s252_s14  ;;  %s268_s23 = sadd.s32 %s1047_s9, %s252_s14  ;;  %608 = vmatpush3.msra.mxu0 %v354_v26  ;;  %656 = vmatpush3.msra.mxu1 %v354_v26  ;;  %v347_v8 = vld [vmem:[#allocation7 + $0x18] sm:$0xff]  ;;  %v344_v26 = vld [vmem:[#allocation7] sm:$0xff]  ;;  %s576_s6 = sshll.u32 %s919_s0, 9 }
  0x5a   : > { %v242_v21 = vsel %vm238_vm5, 1, %v870_v7  ;;  %vm254_vm6 = vcmp.ge.s32.totalorder %v1038_v1, %v1083_v19  ;;  %v1089_v22 = vstv %s268_s23  ;;  %s284_s25 = sadd.s32 %s1051_s12, %s268_s23  ;;  %v216_v25 = vadd.s32 %v212_v16, %v200_v12  ;;  %609 = vmatprep.subr.mxu0 %v353_v32  ;;  %641 = vmatprep.subr.mxu1 %v353_v32  ;;  %v346_v16 = vld [vmem:[#allocation7 + $0x10] sm:$0xff]  ;;  %s1246_s27 = scalar_lea.hbm %s1292_s3, %s576_s6 }
  0x5b   : > { %v230_v23 = vadd.s32 %v226_v18, %v214_v17  ;;  %vm270_vm8 = vcmp.ge.s32.totalorder %v1038_v1, %v1089_v22  ;;  %v1096_v24 = vstv %s284_s25  ;;  %s300_s29 = sadd.s32 %s1055_s4, %s284_s25  ;;  %v258_v27 = vsel %vm254_vm6, 1, %v870_v7  ;;  %610 = vmatpush3.msra.mxu0 %v353_v32  ;;  %657 = vmatpush3.msra.mxu1 %v353_v32  ;;  %s793_s0 = scalar_lea.vmem %s1241_s5, 512 }
  0x5c   : > { %vm286_vm9 = vcmp.ge.s32.totalorder %v1038_v1, %v1096_v24  ;;  %v1102_v28 = vstv %s300_s29  ;;  %vm224_vm10 = vcmp.ge.s32.totalorder %v1043_v2, %v1067_v11  ;;  %v274_v30 = vsel %vm270_vm8, 1, %v870_v7  ;;  %611 = vmatprep.subr.mxu0 %v352_v38  ;;  %642 = vmatprep.subr.mxu1 %v352_v38  ;;  %p794_p3 = scmp.ne.s32.totalorder %s1241_s5, %s793_s0 }
  0x5d   : > { %v246_v29 = vadd.s32 %v242_v21, %v230_v23  ;;  %vm302_vm12 = vcmp.ge.s32.totalorder %v1038_v1, %v1102_v28  ;;  %v228_v33 = vsel %vm224_vm10, 1, %v870_v7  ;;  %vm240_vm13 = vcmp.ge.s32.totalorder %v1043_v2, %v1076_v15  ;;  %612 = vmatpush3.msra.mxu0 %v352_v38  ;;  %658 = vmatpush3.msra.mxu1 %v352_v38 }
  0x5e   : > { %vm256_vm14 = vcmp.ge.s32.totalorder %v1043_v2, %v1083_v19  ;;  %v290_v35 = vsel %vm286_vm9, 1, %v870_v7  ;;  %v232_v36 = vadd.s32 %v228_v33, %v216_v25  ;;  %v244_v37 = vsel %vm240_vm13, 1, %v870_v7  ;;  %613 = vmatprep.subr.mxu0 %v351_v45  ;;  %643 = vmatprep.subr.mxu1 %v351_v45  ;;  %p795_p7 = pnand %p794_p3, %p1308_p11 }
  0x5f   : > { %v262_v34 = vadd.s32 %v258_v27, %v246_v29  ;;  %v260_v39 = vsel %vm256_vm14, 1, %v870_v7  ;;  %vm272_vm15 = vcmp.ge.s32.totalorder %v1043_v2, %v1089_v22  ;;  %vm288_vm0 = vcmp.ge.s32.totalorder %v1043_v2, %v1096_v24  ;;  %614 = vmatpush3.msra.mxu0 %v351_v45  ;;  %659 = vmatpush3.msra.mxu1 %v351_v45 }
  0x60   : > { %v211_v40 = vsel %vm207_vm11, 1, %v870_v7  ;;  %v306_v42 = vsel %vm302_vm12, 1, %v870_v7  ;;  %v248_v43 = vadd.s32 %v244_v37, %v232_v36  ;;  %v276_v46 = vsel %vm272_vm15, 1, %v870_v7  ;;  %615 = vmatprep.subr.mxu0 %v350_v52  ;;  %644 = vmatprep.subr.mxu1 %v350_v52  ;;  %v184_v36 = vld [vmem:[%s1026_s24 + $0x10] sm:$0xff]  ;;  %p796_p9 = pneg %p795_p7 }
  0x61   : > { %v278_v41 = vadd.s32 %v274_v30, %v262_v34  ;;  %v292_v47 = vsel %vm288_vm0, 1, %v870_v7  ;;  %v215_v48 = vadd.s32 %v211_v40, %v199_v31  ;;  %vm223_vm1 = vcmp.ge.s32.totalorder %v1063_v10, %v1067_v11  ;;  %616 = vmatpush3.msra.mxu0 %v350_v52  ;;  %660 = vmatpush3.msra.mxu1 %v350_v52  ;;  %v183_v30 = vld [vmem:[%s1026_s24 + $0x8] sm:$0xff]  ;;  %v185_v34 = vld [vmem:[%s1026_s24 + $0x18] sm:$0xff] }
  0x62   : > { %v264_v50 = vadd.s32 %v260_v39, %v248_v43  ;;  %v227_v51 = vsel %vm223_vm1, 1, %v870_v7  ;;  %vm239_vm2 = vcmp.ge.s32.totalorder %v1063_v10, %v1076_v15  ;;  %vm255_vm3 = vcmp.ge.s32.totalorder %v1063_v10, %v1083_v19  ;;  %617 = vmatprep.subr.mxu0 %v349_v57  ;;  %645 = vmatprep.subr.mxu1 %v349_v57 }
  0x63   : > { %v294_v49 = vadd.s32 %v290_v35, %v278_v41  ;;  %v231_v53 = vadd.s32 %v227_v51, %v215_v48  ;;  %v243_v54 = vsel %vm239_vm2, 1, %v870_v7  ;;  %vm271_vm4 = vcmp.ge.s32.totalorder %v1063_v10, %v1089_v22  ;;  %618 = vmatpush3.msra.mxu0 %v349_v57  ;;  %661 = vmatpush3.msra.mxu1 %v349_v57 }
  0x64   : > { %v280_v55 = vadd.s32 %v276_v46, %v264_v50  ;;  %vm304_vm5 = vcmp.ge.s32.totalorder %v1043_v2, %v1102_v28  ;;  %v259_v56 = vsel %vm255_vm3, 1, %v870_v7  ;;  %vm287_vm6 = vcmp.ge.s32.totalorder %v1063_v10, %v1096_v24  ;;  %619 = vmatprep.subr.mxu0 %v348_v63  ;;  %646 = vmatprep.subr.mxu1 %v348_v63 }
  0x65   : > { %v247_v58 = vadd.s32 %v243_v54, %v231_v53  ;;  %v310_v59 = vadd.s32 %v306_v42, %v294_v49  ;;  %v275_v62 = vsel %vm271_vm4, 1, %v870_v7  ;;  %v308_v3 = vsel %vm304_vm5, 1, %v870_v7  ;;  %620 = vmatpush3.msra.mxu0 %v348_v63  ;;  %662 = vmatpush3.msra.mxu1 %v348_v63 }
  0x66   : > { %v296_v61 = vadd.s32 %v292_v47, %v280_v55  ;;  %vm303_vm7 = vcmp.ge.s32.totalorder %v1063_v10, %v1102_v28  ;;  %vm197_vm8 = vcmp.ge.s32.totalorder %v1139_v44, %v1049_v5  ;;  %v291_v0 = vsel %vm287_vm6, 1, %v870_v7  ;;  %621 = vmatprep.subr.mxu0 %v347_v8  ;;  %647 = vmatprep.subr.mxu1 %v347_v8 }
  0x67   : > { %v263_v4 = vadd.s32 %v259_v56, %v247_v58  ;;  %v201_v6 = vsel %vm197_vm8, 1, %v870_v7  ;;  %vm209_vm9 = vcmp.ge.s32.totalorder %v1139_v44, %v1060_v9  ;;  %vm225_vm10 = vcmp.ge.s32.totalorder %v1139_v44, %v1067_v11  ;;  %622 = vmatpush3.msra.mxu0 %v347_v8  ;;  %663 = vmatpush3.msra.mxu1 %v347_v8 }
  0x68   : > { %v213_v5 = vsel %vm209_vm9, 1, %v870_v7  ;;  %v229_v13 = vsel %vm225_vm10, 1, %v870_v7  ;;  %vm241_vm11 = vcmp.ge.s32.totalorder %v1139_v44, %v1076_v15  ;;  %v312_v14 = vadd.s32 %v308_v3, %v296_v61  ;;  %623 = vmatprep.subr.mxu0 %v346_v16  ;;  %648 = vmatprep.subr.mxu1 %v346_v16 }
  0x69   : > { %v279_v12 = vadd.s32 %v275_v62, %v263_v4  ;;  %v307_v9 = vsel %vm303_vm7, 1, %v870_v7  ;;  %v217_v11 = vadd.s32 %v213_v5, %v201_v6  ;;  %vm257_vm12 = vcmp.ge.s32.totalorder %v1139_v44, %v1083_v19  ;;  %624 = vmatpush3.msra.mxu0 %v346_v16  ;;  %664 = vmatpush3.msra.mxu1 %v346_v16 }
  0x6a   : > { %v245_v18 = vsel %vm241_vm11, 1, %v870_v7  ;;  %vm314_vm13 = vcmp.lt.s32.totalorder %v1038_v1, %v1102_v28  ;;  %vm273_vm14 = vcmp.ge.s32.totalorder %v1139_v44, %v1089_v22  ;;  %vm320_vm15 = vcmp.eq.s32.totalorder %v1159_v60, %v310_v59  ;;  %625 = vmatprep.subr.mxu0 %v345_v20  ;;  %649 = vmatprep.subr.mxu1 %v345_v20 }
  0x6b   : > { %v295_v17 = vadd.s32 %v291_v0, %v279_v12  ;;  %v233_v15 = vadd.s32 %v229_v13, %v217_v11  ;;  %vm316_vm0 = vcmp.lt.s32.totalorder %v1043_v2, %v1102_v28  ;;  %v261_v23 = vsel %vm257_vm12, 1, %v870_v7  ;;  %vm332_vm5 = vmand %vm320_vm15, %vm314_vm13  ;;  %626 = vmatpush3.msra.mxu0 %v345_v20  ;;  %665 = vmatpush3.msra.mxu1 %v345_v20 }
  0x6c   : > { %vm322_vm1 = vcmp.eq.s32.totalorder %v1159_v60, %v312_v14  ;;  %vm289_vm2 = vcmp.ge.s32.totalorder %v1139_v44, %v1096_v24  ;;  %vm315_vm3 = vcmp.lt.s32.totalorder %v1063_v10, %v1102_v28  ;;  %v277_v19 = vsel %vm273_vm14, 1, %v870_v7  ;;  %627 = vmatprep.subr.mxu0 %v344_v26  ;;  %650 = vmatprep.subr.mxu1 %v344_v26 }
  0x6d   : > { %v311_v21 = vadd.s32 %v307_v9, %v295_v17  ;;  %v249_v25 = vadd.s32 %v245_v18, %v233_v15  ;;  %vm305_vm6 = vcmp.ge.s32.totalorder %v1139_v44, %v1102_v28  ;;  %vm334_vm7 = vmand %vm322_vm1, %vm316_vm0  ;;  %v293_v1 = vsel %vm289_vm2, 1, %v870_v7  ;;  %628 = vmatpush3.msra.mxu0 %v344_v26  ;;  %666 = vmatpush3.msra.mxu1 %v344_v26 }
  0x6e   : > { %v309_v22 = vsel %vm305_vm6, 1, %v870_v7  ;;  %v871_v2 = vmov 1.0   ;;  %vm317_vm9 = vcmp.lt.s32.totalorder %v1139_v44, %v1102_v28  ;;  %v182_v7 = vld [vmem:[%s1026_s24] sm:$0xff]  ;;  %s872_s24 = smov [#allocation9]  }
  0x6f   : > { %vm321_vm4 = vcmp.eq.s32.totalorder %v1159_v60, %v311_v21  ;;  %v265_v27 = vadd.s32 %v261_v23, %v249_v25  ;;  %629 = vmatprep.mubr.msk.f32.mxu0 %vm332_vm5, %v871_v2  ;;  %632 = vmatprep.mubr.msk.f32.mxu1 %vm334_vm7, %v871_v2  ;;  %s797_s12 = sshll.u32 %s872_s24, 4  ;;  %s798_s12 = int_to_ptr.vmem [resolvable:$false] %s797_s12 }
  0x70   : > { %vm333_vm8 = vmand %vm321_vm4, %vm315_vm3  ;;  %s799_s13 = scalar_lea.vmem %s798_s12, 1024  ;;  %p800_p10 = scmp.lt.s32.totalorder %s1241_s5, %s798_s12 }
  0x71   : > { %v281_v10 = vadd.s32 %v277_v19, %v265_v27  ;;  %630 = vmatmul.mubr.msk.f32.vlgmr.msra.gmra.mxu0 %vm333_vm8, %v871_v2  ;;  %p801_p12 = scmp.lt.s32.totalorder %s799_s13, %s793_s0 }
  0x73   : > { %v297_v29 = vadd.s32 %v293_v1, %v281_v10  ;;  %p802_p13 = por %p801_p12, %p800_p10 }
  0x75   : > { %v313_v24 = vadd.s32 %v309_v22, %v297_v29  ;;  %p803_p0 = pnand %p802_p13, %p796_p9 }
  0x77   : > { %vm323_vm10 = vcmp.eq.s32.totalorder %v1159_v60, %v313_v24 }
  0x78   : > { %vm335_vm11 = vmand %vm323_vm10, %vm317_vm9 }
  0x79   : > { %633 = vmatmul.mubr.msk.f32.vlgmr.msra.gmra.mxu1 %vm335_vm11, %v871_v2 }
 0x131   : > { %v631_v31 = vpop.f32.mrf.mxu0 }
 0x132   : > { %v446_v32 = vadd.f32 %v631_v31, %v183_v30 }
 0x133   : > { %v426_v33 = vpop.f32.mrf.mxu0 }
 0x134   : > { %450 = vst [vmem:[%s181_s20 + $0x8] sm:$0xff] %v446_v32  ;;  %v445_v35 = vadd.f32 %v426_v33, %v182_v7 }
 0x136   : > { %449 = vst [vmem:[%s181_s20] sm:$0xff] %v445_v35 }
 0x139   : > { %v634_v28 = vpop.f32.mrf.mxu1 }
 0x13a   : > { %v448_v37 = vadd.f32 %v634_v28, %v185_v34 }
 0x13b   : > { %v436_v38 = vpop.f32.mrf.mxu1 }
 0x13c   : > { %452 = vst [vmem:[%s181_s20 + $0x18] sm:$0xff] %v448_v37  ;;  %v447_v39 = vadd.f32 %v436_v38, %v184_v36 }
 0x13e   : > { %451 = vst [vmem:[%s181_s20 + $0x10] sm:$0xff] %v447_v39 }
 0x13f   : > { %806 = shalt.err (!%p803_p0)
}
 0x140   : > { %s807_s28 = scalar_lea.hbm %s1246_s27, 512  ;;  %s811_s30 = scalar_lea.hbm %s1292_s3, 1024 }
 0x141   : > { %p808_p5 = scmp.ne.s32.totalorder %s1246_s27, %s807_s28  ;;  %p812_p4 = scmp.lt.s32.totalorder %s1246_s27, %s1292_s3 }
 0x142   : > { %p813_p6 = scmp.lt.s32.totalorder %s811_s30, %s807_s28 }
 0x143   : > { %p809_p2 = pnand %p808_p5, %p1308_p11 }
 0x144   : > { %p814_p8 = por %p813_p6, %p812_p4 }
 0x145   : > { %p810_p1 = pneg %p809_p2 }
 0x147   : > { %p815_p3 = pnand %p814_p8, %p810_p1 }
 0x149   : > { %818 = shalt.err (!%p815_p3)
}
 0x14a   : > { %s873_s25 = smov 128   ;;  %s874_s29 = smov 8  }
 0x14b   : > { %673 = dma.vmem_to_hbm [thread:$0]  (%p1308_p11), %s1241_s5, 512, %s1246_s27, %s454_s11, %s873_s25, %s873_s25, %s874_s29  }
 0x14c PF: > { %s482_s20 = sand.u32 1, %s851_s15   ;;  %p1309_p7 = scmp.ne.s32.totalorder %s1298_s21, 0 }
 0x14d   : > { %p1310_p9 = scmp.ge.s32.totalorder %s863_s18, 2  ;;  %s483_s6 = scalar_lea.sflag [#allocation6], %s482_s20 }
 0x14f   : > { %p684_p10 = pnand %p1310_p9, %p1309_p7 }
 0x151   : > { %p685_p12 = pneg %p684_p10 }
 0x153   : > { %846 = dma.done.wait (%p685_p12), %s483_s6, 512  }
 0x154   : > { %848 = vsyncadd (%p685_p12), %s483_s6, 4294966784  ;;  %p21_p13 = scmp.ge.s32.totalorder %s952_s26, 4   ;;  %s1311_s15 = smov %s855_s16 }
 0x155   : > { %s1312_s16 = smov %s859_s17  ;;  %s1313_s17 = smov %s972_s7 }
 0x156   : > { %s1314_s18 = smov %s952_s26  ;;  %23 = sbr.rel (!%p21_p13) target bundleno = 11 (0xb), region = 77 }
 0x15b   :  { %488 = vsyncpa [#allocation5], 1 }
 0x15c   :  { %490 = vsyncpa [#allocation5 + $0x1], 1 }
 0x15d   :  { %491 = vsyncpa [#allocation8], 1 }
 0x15e   :  { %492 = vsyncpa [#allocation6], 1 }
 0x15f   :  { %494 = vsyncpa [#allocation6 + $0x1], 1 }

</bundles_post_ra>
